<compile_context>
chip_gen: v5e
topology: v5e:2x2
jax: 0.10.0
libtpu: 0.0.40
codegen_flags: <defaults>
</compile_context>

<pallas_src>
import functools

import jax
import jax.numpy as jnp
import numpy as np
from jax.experimental import pallas as pl
from jax.experimental.pallas import tpu as pltpu


# ---------------------------------------------------------------------------
# Kernel: per (batch-block, spatial-tile) block compute  out[b] = W^T @ x[b] + b
#   x_ref : (Nb, C,  ts)   activation tile, spatial dim lane-dense
#   wt_ref: (Co, C)        transposed NIN weight (resident across the block)
#   b_ref : (Co, 1)        bias column (broadcast over lanes)
#   o_ref : (Nb, Co, ts)   lane-dense output tile
# ---------------------------------------------------------------------------
def _nin_kernel(x_ref, wt_ref, b_ref, o_ref):
    wt = wt_ref[...]
    bias = b_ref[...].astype(jnp.float32)          # (Co, 1)
    for i in range(x_ref.shape[0]):                # static, small unroll (Nb <= 16)
        acc = jnp.dot(wt, x_ref[i], preferred_element_type=jnp.float32)
        o_ref[i] = (acc + bias).astype(o_ref.dtype)


# ---------------------------------------------------------------------------
# Generation-specific budgets (bytes).
#   tile_budget : cap on live double-buffered in+out tile bytes
#   target_step : desired HBM traffic per grid step (amortize ~0.35us overhead)
#   vmem_limit  : value passed to CompilerParams(vmem_limit_bytes=...)
# ---------------------------------------------------------------------------
def _tpu_budgets():
    kind = ""
    try:
        kind = jax.devices()[0].device_kind.lower()
    except Exception:
        pass
    if "v7" in kind or "7x" in kind:
        # 64 MiB physical VMEM, 3.2 TB/s HBM -> bigger steps, tighter VMEM cap.
        return dict(vmem_limit=28 << 20, tile_budget=24 << 20, target_step=8 << 20)
    if "v6" in kind:
        return dict(vmem_limit=80 << 20, tile_budget=64 << 20, target_step=4 << 20)
    if "v5" in kind:
        return dict(vmem_limit=56 << 20, tile_budget=48 << 20, target_step=3 << 20)
    # Unknown / CPU-interpret: conservative.
    return dict(vmem_limit=28 << 20, tile_budget=24 << 20, target_step=4 << 20)


def _choose_tiling(N, C, Co, S_pad, itemsize, tile_budget, target_step):
    """Pick (Nb, ts): batch-block and lane-dense spatial tile."""
    per_elem = (C + Co) * itemsize          # in + out bytes per (batch, spatial) element
    units = S_pad // 128                    # S_pad is a multiple of 128

    # Largest ts = 128*k with k | units whose double-buffered tiles fit the budget.
    ts_cap_units = max(1, tile_budget // (2 * per_elem * 128))
    k = max(d for d in range(1, units + 1) if units % d == 0 and d <= ts_cap_units)
    ts = 128 * k

    # Batch blocking: grow Nb (divisor of N, capped to keep the unroll sane) until
    # the per-step traffic hits the target or the VMEM budget is reached.
    nb = 1
    for d in range(1, min(N, 16) + 1):
        if N % d:
            continue
        if 2 * d * per_elem * ts > tile_budget:
            break
        nb = d
        if d * per_elem * ts >= target_step:
            break

    # Keep >= 2 grid steps when possible (v7x shards parallel axes over 2 TCs).
    def steps(nb_, ts_):
        return (N // nb_) * (S_pad // ts_)

    if steps(nb, ts) < 2 and nb > 1:
        nb = max(d for d in range(1, nb) if N % d == 0)
    if steps(nb, ts) < 2 and units > 1:
        ts = 128 * max(d for d in range(1, units) if units % d == 0)

    return nb, ts


@functools.partial(jax.jit, static_argnames=())
def nin_forward(x_ncdhw, W, b):
    """NIN forward. x_ncdhw: (N, C, D, H, W); W: (C, Co); b: (Co,)."""
    N, C, D, H, Wsp = x_ncdhw.shape
    Co = W.shape[1]
    S = D * H * Wsp
    S_pad = ((S + 127) // 128) * 128
    itemsize = jnp.dtype(x_ncdhw.dtype).itemsize

    budgets = _tpu_budgets()
    Nb, ts = _choose_tiling(N, C, Co, S_pad, itemsize,
                            budgets["tile_budget"], budgets["target_step"])

    x3 = x_ncdhw.reshape(N, C, S)            # contiguous reshape, no transpose
    if S_pad != S:
        x3 = jnp.pad(x3, ((0, 0), (0, 0), (0, S_pad - S)))
    wt = jnp.transpose(W)                    # (Co, C) — tiny
    b2 = b.reshape(Co, 1)

    cost = pl.CostEstimate(
        flops=2 * N * S_pad * C * Co,
        bytes_accessed=(N * S_pad * (C + Co) + C * Co + Co) * itemsize,
        transcendentals=0,
    )

    out3 = pl.pallas_call(
        _nin_kernel,
        out_shape=jax.ShapeDtypeStruct((N, Co, S_pad), x_ncdhw.dtype),
        grid_spec=pltpu.PrefetchScalarGridSpec(
            num_scalar_prefetch=0,
            grid=(N // Nb, S_pad // ts),
            in_specs=[
                pl.BlockSpec((Nb, C, ts), lambda n, s: (n, 0, s)),
                pl.BlockSpec((Co, C), lambda n, s: (0, 0)),
                pl.BlockSpec((Co, 1), lambda n, s: (0, 0)),
            ],
            out_specs=pl.BlockSpec((Nb, Co, ts), lambda n, s: (n, 0, s)),
        ),
        compiler_params=pltpu.CompilerParams(
            dimension_semantics=("parallel", "parallel"),
            vmem_limit_bytes=budgets["vmem_limit"],
        ),
        cost_estimate=cost,
    )(x3, wt, b2)

    if S_pad != S:
        out3 = out3[:, :, :S]
    return out3.reshape(N, Co, D, H, Wsp)


# ---------------------------------------------------------------------------
# Pure-JAX reference mirroring the PyTorch forward (permute / tensordot / permute)
# ---------------------------------------------------------------------------
def reference_forward(x_ncdhw, W, b):
    xp = jnp.transpose(x_ncdhw, (0, 2, 3, 4, 1))          # NDHWC
    y = jnp.tensordot(xp, W, axes=1) + b                   # contract_inner(x, W) + b
    return jnp.transpose(y, (0, 4, 1, 2, 3))               # back to NCDHW


if __name__ == "__main__":
    N, Cin, Cout = 2, 4, 8
    D = H = Wd = 8

    key = jax.random.PRNGKey(0)
    kx, kw, kb = jax.random.split(key, 3)

    x = jax.random.normal(kx, (N, Cin, D, H, Wd), jnp.float32)   # NCDHW
    W = jax.random.normal(kw, (Cin, Cout), jnp.float32) * 0.1    # NIN weight (C, Co)
    b = jax.random.normal(kb, (Cout,), jnp.float32) * 0.1        # bias (zeros at init
                                                                 # in PyTorch; nonzero
                                                                 # here to exercise it)

    out = jax.block_until_ready(nin_forward(x, W, b))

    ref = reference_forward(x, W, b)
    np.testing.assert_allclose(np.asarray(out), np.asarray(ref), rtol=1e-5, atol=1e-5)
    assert out.shape == (N, Cout, D, H, Wd)
    print("KERNEL_OK")
</pallas_src>

<mosaic_0001>
module attributes {stable_mosaic.version = 11 : i64} {
  func.func @_nin_kernel(%arg0: i32, %arg1: i32, %arg2: memref<1x4x512xf32, #tpu.memory_space<vmem>>, %arg3: memref<8x4xf32, #tpu.memory_space<vmem>>, %arg4: memref<8x1xf32, #tpu.memory_space<vmem>>, %arg5: memref<1x8x512xf32, #tpu.memory_space<vmem>>) attributes {dimension_semantics = [#tpu.dimension_semantics<parallel>, #tpu.dimension_semantics<parallel>], iteration_bounds = array<i64: 2, 1>, scalar_prefetch = 0 : i64, scratch_operands = 0 : i64, tpu.core_type = #tpu.core_type<tc>, window_params = [{transform_indices = @transform_0, window_bounds = array<i64: 1, 4, 512>}, {pipeline_mode = #tpu.pipeline_mode<synchronous>, transform_indices = @transform_1, window_bounds = array<i64: 8, 4>}, {pipeline_mode = #tpu.pipeline_mode<synchronous>, transform_indices = @transform_2, window_bounds = array<i64: 8, 1>}, {transform_indices = @transform_3, window_bounds = array<i64: 1, 8, 512>}]} {
    %c0 = arith.constant 0 : index
    %c0_0 = arith.constant 0 : index
    %0 = vector.load %arg3[%c0, %c0_0] : memref<8x4xf32, #tpu.memory_space<vmem>>, vector<8x4xf32>
    %c0_1 = arith.constant 0 : index
    %c0_2 = arith.constant 0 : index
    %1 = vector.load %arg4[%c0_1, %c0_2] : memref<8x1xf32, #tpu.memory_space<vmem>>, vector<8x1xf32>
    %c0_3 = arith.constant 0 : index
    %c0_4 = arith.constant 0 : index
    %c0_5 = arith.constant 0 : index
    %2 = vector.load %arg2[%c0_3, %c0_4, %c0_5] : memref<1x4x512xf32, #tpu.memory_space<vmem>>, vector<1x4x512xf32>
    %3 = vector.shape_cast %2 : vector<1x4x512xf32> to vector<4x512xf32>
    %cst = arith.constant dense<0.000000e+00> : vector<8x512xf32>
    %4 = tpu.matmul %0, %3, %cst {dimension_numbers = #tpu.dot_dimension_numbers<[1], [0], [0], [1], [0, 0, 1, 1], [], []>} : vector<8x4xf32>, vector<4x512xf32>, vector<8x512xf32> -> vector<8x512xf32>
    %5 = vector.broadcast %1 : vector<8x1xf32> to vector<8x512xf32>
    %6 = arith.addf %4, %5 : vector<8x512xf32>
    %c0_6 = arith.constant 0 : index
    %c0_7 = arith.constant 0 : index
    %c0_8 = arith.constant 0 : index
    %7 = vector.load %arg5[%c0_6, %c0_7, %c0_8] : memref<1x8x512xf32, #tpu.memory_space<vmem>>, vector<1x8x512xf32>
    %8 = vector.shape_cast %7 : vector<1x8x512xf32> to vector<8x512xf32>
    %9 = vector.shape_cast %6 : vector<8x512xf32> to vector<1x8x512xf32>
    tpu.vector_store %arg5[%c0_6, %c0_7, %c0_8], %9 {strides = array<i32>} : memref<1x8x512xf32, #tpu.memory_space<vmem>>, vector<1x8x512xf32>,
    return
  }
  func.func @transform_0(%arg0: i32, %arg1: i32) -> (i32, i32, i32) {
    %c0_i32 = arith.constant 0 : i32
    %c0_i32_0 = arith.constant 0 : i32
    return %arg0, %c0_i32, %arg1 : i32, i32, i32
  }
  func.func @transform_1(%arg0: i32, %arg1: i32) -> (i32, i32) {
    %c0_i32 = arith.constant 0 : i32
    %c0_i32_0 = arith.constant 0 : i32
    %c0_i32_1 = arith.constant 0 : i32
    return %c0_i32, %c0_i32_0 : i32, i32
  }
  func.func @transform_2(%arg0: i32, %arg1: i32) -> (i32, i32) {
    %c0_i32 = arith.constant 0 : i32
    %c0_i32_0 = arith.constant 0 : i32
    %c0_i32_1 = arith.constant 0 : i32
    return %c0_i32, %c0_i32_0 : i32, i32
  }
  func.func @transform_3(%arg0: i32, %arg1: i32) -> (i32, i32, i32) {
    %c0_i32 = arith.constant 0 : i32
    %c0_i32_0 = arith.constant 0 : i32
    return %arg0, %c0_i32, %arg1 : i32, i32, i32
  }
}

</mosaic_0001>

<bundles_post_ra>
// kernel: nin_forward.1
= control target key start
LH: loop header
LB: loop body
LE: loop exit
PB: predicated region body
PF: predicated region fallthrough
CT: control target
= control target key end

     0   :  { %s504_s12 = smov 0   ;;  %s506_s13 = smov 0   ;;  %s543_s0 = inlined_call_operand.vmem [shape: f32[2,4,512], index: 0, kind: input, shape index: {}]   ;;  %s544_s1 = inlined_call_operand.vmem [shape: f32[8,4], index: 1, kind: input, shape index: {}]   ;;  %s545_s2 = inlined_call_operand.vmem [shape: f32[8,1], index: 2, kind: input, shape index: {}]   ;;  %s546_s3 = inlined_call_operand.vmem [shape: f32[2,8,512], index: 3, kind: output, shape index: {}]  }
   0x1   :  { %s508_s14 = smov 0  }
   0x2 LB: > { %s25_s15 = sadd.s32 1, %s477_s13  ;;  %p416_p0 = scmp.ge.s32.totalorder %s481_s14, 1  ;;  %s481_s14 = sphi %s508_s14, %s13_s14   ;;  %s477_s13 = sphi %s506_s13, %s548_s13   ;;  %s473_s12 = sphi %s504_s12, %s547_s12  }
   0x3   : > { %p27_p1 = scmp.ge.s32.totalorder %s25_s15, 2  ;;  %p158_p2 = scmp.lt.s32.totalorder %s481_s14, 3 }
   0x5   : > { %s550_s15 = smov (%p27_p1, %s25_s15), 0  ;;  %p159_p3 = pnand %p416_p0, %p158_p2 }
   0x6   : > { %p191_p4 = scmp.lt.s32.totalorder (!%p159_p3), %s473_s12, 1 }
   0x7   : > { %162 = sbr.rel (%p159_p3) target bundleno = 161 (0xa1), region = 32 }
   0xc   : > { %v211_v0 = vld [vmem:[%s545_s2] sm:$0xff]  ;;  %v483_v1 = vmov 0   ;;  %s552_s12 = smov (!%p191_p4, %s473_s12), 1  ;;  %vm232_vm0 = vcmask 1043456   ;;  %vm228_vm1 = vcmask 31744  }
   0xd   : > { %458 = vset.pattern.permute.xlu0 %v483_v1  ;;  %s431_s18 = sshll.u32 %s552_s12, 4  ;;  %v210_v4 = vld [vmem:[%s544_s1] sm:$0xff]  ;;  %s432_s24 = sshll.u32 %s552_s12, 5 }
   0xe   : > { %216 = vperm.xlu0 %458, %v211_v0   ;;  %s198_s21 = scalar_lea.vmem %s543_s0, %s431_s18  ;;  %s208_s27 = scalar_lea.vmem %s546_s3, %s432_s24 }
   0xf   : > { %v213_v2 = vld [vmem:[%s198_s21 + $0x8] sm:$0xff]  ;;  %v212_v3 = vld [vmem:[%s198_s21] sm:$0xff] }
  0x10   : > { %223 = vst [vmem:[#allocation1 + $0x10] ss:$2 sm:$0xff] %v213_v2 }
  0x11   : > { %221 = vst [vmem:[#allocation1] ss:$2 sm:$0xff] %v212_v3 }
  0x17   : > { %v226_v5 = vld.sshfl [vmem:[#allocation1 + $0x10] sm:$0xff pattern:$0x75316420]  ;;  %v227_v6 = vld.sshfl [vmem:[#allocation1 + $0x18] sm:$0xff pattern:$0x75316420] }
  0x18   : > { %425 = vmatpush.msk.msra.mxu2 %vm232_vm0, %v226_v5  ;;  %427 = vmatpush.msk.msra.mxu3 %vm232_vm0, %v227_v6  ;;  %v224_v7 = vld.sshfl [vmem:[#allocation1] sm:$0xff pattern:$0x75316420]  ;;  %v225_v8 = vld.sshfl [vmem:[#allocation1 + $0x8] sm:$0xff pattern:$0x75316420] }
  0x19   : > { %426 = vmatmul.msk.f32.vlgmr.msra.gmra.mxu2 %vm228_vm1, %v210_v4  ;;  %428 = vmatmul.msk.f32.vlgmr.msra.gmra.mxu3 %vm228_vm1, %v210_v4 }
  0x1a   : > { %421 = vmatpush.msk.msra.mxu0 %vm232_vm0, %v224_v7  ;;  %423 = vmatpush.msk.msra.mxu1 %vm232_vm0, %v225_v8 }
  0x1b   : > { %422 = vmatmul.msk.f32.vlgmr.msra.gmra.mxu0 %vm228_vm1, %v210_v4  ;;  %424 = vmatmul.msk.f32.vlgmr.msra.gmra.mxu1 %vm228_vm1, %v210_v4 }
  0x80   : > { %v217_v9 = vpop.permute.xlu0 %216 }
  0x98   : > { %v258_v10 = vpop.f32.mrf.mxu0  ;;  %v278_v11 = vpop.f32.mrf.mxu1 }
  0x99   : > { %v259_v12 = vadd.f32 %v258_v10, %v217_v9  ;;  %v279_v13 = vadd.f32 %v278_v11, %v217_v9 }
  0x9b   : > { %321 = vst [vmem:[%s208_s27] sm:$0xff] %v259_v12 }
  0x9c   : > { %322 = vst [vmem:[%s208_s27 + $0x8] sm:$0xff] %v279_v13  ;;  %v298_v14 = vpop.f32.mrf.mxu2  ;;  %v318_v15 = vpop.f32.mrf.mxu3 }
  0x9d   : > { %v299_v16 = vadd.f32 %v298_v14, %v217_v9  ;;  %v319_v17 = vadd.f32 %v318_v15, %v217_v9 }
  0x9f   : > { %323 = vst [vmem:[%s208_s27 + $0x10] sm:$0xff] %v299_v16 }
  0xa0   : > { %324 = vst [vmem:[%s208_s27 + $0x18] sm:$0xff] %v319_v17 }
  0xa1 PF: > { %s13_s14 = sadd.s32 1, %s481_s14   ;;  %s547_s12 = smov %s477_s13 }
  0xa2   : > { %p10_p5 = scmp.ge.s32.totalorder %s13_s14, 4   ;;  %s548_s13 = smov %s550_s15 }
  0xa4   :  { %12 = sbr.rel (!%p10_p5) target bundleno = 2 (0x2), region = 63 }

</bundles_post_ra>
